<compile_context>
chip_gen: v7x
topology: tpu7x:2x2x1
jax: 0.10.0
libtpu: 0.0.40
codegen_flags: <defaults>
</compile_context>

<pallas_src>
import functools
import math

import jax
import jax.numpy as jnp
from jax.experimental import pallas as pl
from jax.experimental.pallas import tpu as pltpu


# ----------------------------------------------------------------------------
# Hardware-aware VMEM budgets
# ----------------------------------------------------------------------------
def _vmem_capacity_bytes():
    try:
        info = pltpu.get_tpu_info()
        cap = getattr(info, "vmem_capacity_bytes", None)
        if cap:
            return int(cap)
    except Exception:
        pass
    return 64 * 1024 * 1024  # conservative default (v7x per-core VMEM)


def _vmem_limit_bytes():
    cap = _vmem_capacity_bytes()
    # Leave headroom for compiler-internal scratch; never request >64 MiB
    # scoped.  v5e/v6e (128 MiB) -> 64 MiB; v7x (64 MiB) -> 48 MiB.
    return int(min(max(cap - 16 * 2**20, 32 * 2**20), 64 * 2**20))


# ----------------------------------------------------------------------------
# Fused single-pass kernel: whole sample resident -> stable centered variance
# ----------------------------------------------------------------------------
def _fused_kernel(x_ref, gamma_ref, beta_ref, o_ref, *, n_elems, eps):
    x = x_ref[...].astype(jnp.float32)                        # (1, R, Lc)
    mean = jnp.sum(x, keepdims=True) * (1.0 / n_elems)        # (1, 1, 1)
    d = x - mean                                              # centered
    var = jnp.sum(d * d, keepdims=True) * (1.0 / max(n_elems - 1, 1))
    inv = 1.0 / (jnp.sqrt(var) + eps)                         # 1/(std + eps)
    scale = gamma_ref[...] * inv                              # (1, R, 1)
    o_ref[...] = (d * scale + beta_ref[...]).astype(o_ref.dtype)


# ----------------------------------------------------------------------------
# Tiled pass 1: per-sample running sum / sum-of-squares -> mean, 1/(std + eps)
# ----------------------------------------------------------------------------
def _stats_kernel(x_ref, mean_ref, inv_ref, *, n_elems, eps):
    t = pl.program_id(1)

    @pl.when(t == 0)
    def _init():
        mean_ref[...] = jnp.zeros_like(mean_ref)
        inv_ref[...] = jnp.zeros_like(inv_ref)

    x = x_ref[...].astype(jnp.float32)
    mean_ref[...] += jnp.sum(x, keepdims=True)      # running sum
    inv_ref[...] += jnp.sum(x * x, keepdims=True)   # running sum of squares

    @pl.when(t == pl.num_programs(1) - 1)
    def _finalize():
        s = mean_ref[...]
        ss = inv_ref[...]
        mean = s * (1.0 / n_elems)
        # Unbiased (Bessel-corrected) variance -> matches torch.Tensor.std().
        inv_dof = 1.0 / max(n_elems - 1, 1)
        var = jnp.maximum((ss - s * mean) * inv_dof, 0.0)
        mean_ref[...] = mean
        inv_ref[...] = 1.0 / (jnp.sqrt(var) + eps)


# ----------------------------------------------------------------------------
# Tiled pass 2: out = gamma*(x - mean)/(std + eps) + beta  (one FMA / element)
# ----------------------------------------------------------------------------
def _normalize_kernel(x_ref, gamma_ref, beta_ref, mean_ref, inv_ref, o_ref):
    mean = mean_ref[...]                      # (1, 1, 1) per-sample
    inv = inv_ref[...]                        # (1, 1, 1) per-sample
    scale = gamma_ref[...] * inv              # (1, R, 1) per-channel-row
    bias = beta_ref[...] - mean * scale       # (1, R, 1)
    x = x_ref[...].astype(jnp.float32)
    o_ref[...] = (x * scale + bias).astype(o_ref.dtype)


def _choose_col_tile(cols, max_ct):
    """Largest lane tile <= max_ct.  Prefer a 128-aligned divisor of `cols`
    (no padding); otherwise return a 128 multiple and the caller pads."""
    if max_ct >= cols:
        return cols
    max_ct = max(128, (max_ct // 128) * 128)
    for t in range(max_ct, 127, -128):
        if cols % t == 0:
            return t
    return max_ct


def layer_norm(x, gamma, beta, eps=1e-12, *, _force_tiled=False, _col_tile=None):
    """x: (N, C, H, W); gamma/beta: (C,).  Returns (N, C, H, W)."""
    N, C, H, W = x.shape
    L = C * H * W
    itemsize = x.dtype.itemsize

    # Fold part of H into the channel axis so the sublane dim is a multiple of
    # 8 even for small C (free reshape, no transpose / extra HBM pass).
    h1 = 1
    if C % 8 != 0:
        f = 8 // math.gcd(C, 8)
        if H % f == 0:
            h1 = f
    R = C * h1
    Lc = (H // h1) * W
    x3 = x.reshape(N, R, Lc)

    g_rows = jnp.repeat(gamma.astype(jnp.float32), h1).reshape(1, R, 1)
    b_rows = jnp.repeat(beta.astype(jnp.float32), h1).reshape(1, R, 1)

    vmem_limit = _vmem_limit_bytes()
    # Per lane column: double-buffered in + out blocks (x dtype) plus ~two f32
    # temporaries of the compute slab (dtype-aware, per review).
    bytes_per_col = R * (4 * itemsize + 8)

    # ---------------- fused single-pass path ----------------
    fused_bytes = Lc * bytes_per_col + 2 * 2**20     # + headroom
    if (not _force_tiled) and fused_bytes <= vmem_limit:
        out3 = pl.pallas_call(
            functools.partial(_fused_kernel, n_elems=L, eps=eps),
            out_shape=jax.ShapeDtypeStruct((N, R, Lc), x.dtype),
            grid_spec=pltpu.PrefetchScalarGridSpec(
                num_scalar_prefetch=0,
                grid=(N,),
                in_specs=[
                    pl.BlockSpec((1, R, Lc), lambda n: (n, 0, 0)),
                    pl.BlockSpec((1, R, 1), lambda n: (0, 0, 0)),   # gamma
                    pl.BlockSpec((1, R, 1), lambda n: (0, 0, 0)),   # beta
                ],
                out_specs=pl.BlockSpec((1, R, Lc), lambda n: (n, 0, 0)),
            ),
            compiler_params=pltpu.CompilerParams(
                dimension_semantics=("parallel",),
                vmem_limit_bytes=vmem_limit,
            ),
        )(x3, g_rows, b_rows)
        return out3.reshape(N, C, H, W)

    # ---------------- tiled two-pass fallback ----------------
    if _col_tile is not None:
        ct = min(_col_tile, Lc)
    else:
        ct = _choose_col_tile(Lc, (vmem_limit // 2) // bytes_per_col)
    assert ct == Lc or ct % 128 == 0

    Lcp = -(-Lc // ct) * ct
    if Lcp != Lc:
        # Zero padding keeps sum / sum-of-squares exact (true L is used below).
        x3 = jnp.pad(x3, ((0, 0), (0, 0), (0, Lcp - Lc)))
    n_t = Lcp // ct

    stat_shape = jax.ShapeDtypeStruct((N, 1, 1), jnp.float32)
    mean, inv = pl.pallas_call(
        functools.partial(_stats_kernel, n_elems=L, eps=eps),
        out_shape=(stat_shape, stat_shape),
        grid_spec=pltpu.PrefetchScalarGridSpec(
            num_scalar_prefetch=0,
            grid=(N, n_t),
            in_specs=[pl.BlockSpec((1, R, ct), lambda n, t: (n, 0, t))],
            out_specs=(
                pl.BlockSpec((1, 1, 1), lambda n, t: (n, 0, 0)),
                pl.BlockSpec((1, 1, 1), lambda n, t: (n, 0, 0)),
            ),
        ),
        compiler_params=pltpu.CompilerParams(
            dimension_semantics=("parallel", "arbitrary"),
            vmem_limit_bytes=vmem_limit,
        ),
    )(x3)

    out3 = pl.pallas_call(
        _normalize_kernel,
        out_shape=jax.ShapeDtypeStruct((N, R, Lcp), x.dtype),
        grid_spec=pltpu.PrefetchScalarGridSpec(
            num_scalar_prefetch=0,
            grid=(N, n_t),
            in_specs=[
                pl.BlockSpec((1, R, ct), lambda n, t: (n, 0, t)),
                pl.BlockSpec((1, R, 1), lambda n, t: (0, 0, 0)),   # gamma (resident)
                pl.BlockSpec((1, R, 1), lambda n, t: (0, 0, 0)),   # beta  (resident)
                pl.BlockSpec((1, 1, 1), lambda n, t: (n, 0, 0)),   # mean
                pl.BlockSpec((1, 1, 1), lambda n, t: (n, 0, 0)),   # 1/(std+eps)
            ],
            out_specs=pl.BlockSpec((1, R, ct), lambda n, t: (n, 0, t)),
        ),
        compiler_params=pltpu.CompilerParams(
            dimension_semantics=("parallel", "parallel"),
            vmem_limit_bytes=vmem_limit,
        ),
    )(x3, g_rows, b_rows, mean, inv)

    if Lcp != Lc:
        out3 = out3[:, :, :Lc]
    return out3.reshape(N, C, H, W)


def _reference(x, gamma, beta, eps=1e-12):
    """Pure-JAX mirror of the PyTorch LayerNorm.forward for a sanity check."""
    N = x.shape[0]
    xf = x.reshape(N, -1)
    L = xf.shape[1]
    mean = xf.mean(axis=1)
    var = jnp.sum((xf - mean[:, None]) ** 2, axis=1) / (L - 1)  # unbiased std
    std = jnp.sqrt(var)
    y = (x - mean.reshape(N, 1, 1, 1)) / (std.reshape(N, 1, 1, 1) + eps)
    return gamma[None, :, None, None] * y + beta[None, :, None, None]


if __name__ == "__main__":
    key = jax.random.PRNGKey(0)
    kx, kg, kb, kx2, kg2, kb2 = jax.random.split(key, 6)

    # 1) Fused single-pass path (per-sample slab resident in VMEM).
    N, C, H, W = 2, 4, 16, 16
    x = jax.random.normal(kx, (N, C, H, W), dtype=jnp.float32)
    # nn.Parameter defaults are gamma=1, beta=0; perturb deterministically so
    # the affine path is actually exercised.
    gamma = 1.0 + 0.1 * jax.random.normal(kg, (C,), dtype=jnp.float32)
    beta = 0.1 * jax.random.normal(kb, (C,), dtype=jnp.float32)

    out = jax.block_until_ready(layer_norm(x, gamma, beta, eps=1e-12))
    ref = _reference(x, gamma, beta, eps=1e-12)
    assert out.shape == (N, C, H, W)
    assert jnp.allclose(out, ref, atol=1e-4, rtol=1e-4), "fused path mismatch"

    # 2) Tiled two-pass fallback, exercised with an awkward lane extent
    #    (Lc = 360, no 128-aligned divisor) so the padded-tail logic is covered.
    N2, C2, H2, W2 = 2, 3, 10, 36
    x2 = jax.random.normal(kx2, (N2, C2, H2, W2), dtype=jnp.float32)
    gamma2 = 1.0 + 0.1 * jax.random.normal(kg2, (C2,), dtype=jnp.float32)
    beta2 = 0.1 * jax.random.normal(kb2, (C2,), dtype=jnp.float32)

    out2 = jax.block_until_ready(
        layer_norm(x2, gamma2, beta2, eps=1e-12, _force_tiled=True, _col_tile=128))
    ref2 = _reference(x2, gamma2, beta2, eps=1e-12)
    assert out2.shape == (N2, C2, H2, W2)
    assert jnp.allclose(out2, ref2, atol=1e-4, rtol=1e-4), "tiled path mismatch"

    print("KERNEL_OK")
</pallas_src>

<mosaic_0001>
module attributes {stable_mosaic.version = 11 : i64} {
  func.func @_fused_kernel(%arg0: i32, %arg1: memref<1x8x128xf32, #tpu.memory_space<vmem>>, %arg2: memref<1x8x1xf32, #tpu.memory_space<vmem>>, %arg3: memref<1x8x1xf32, #tpu.memory_space<vmem>>, %arg4: memref<1x8x128xf32, #tpu.memory_space<vmem>>) attributes {dimension_semantics = [#tpu.dimension_semantics<parallel>], iteration_bounds = array<i64: 2>, scalar_prefetch = 0 : i64, scratch_operands = 0 : i64, tpu.core_type = #tpu.core_type<tc>, window_params = [{transform_indices = @transform_0, window_bounds = array<i64: 1, 8, 128>}, {pipeline_mode = #tpu.pipeline_mode<synchronous>, transform_indices = @transform_1, window_bounds = array<i64: 1, 8, 1>}, {pipeline_mode = #tpu.pipeline_mode<synchronous>, transform_indices = @transform_2, window_bounds = array<i64: 1, 8, 1>}, {transform_indices = @transform_3, window_bounds = array<i64: 1, 8, 128>}]} {
    %c0 = arith.constant 0 : index
    %c0_0 = arith.constant 0 : index
    %c0_1 = arith.constant 0 : index
    %0 = vector.load %arg1[%c0, %c0_0, %c0_1] : memref<1x8x128xf32, #tpu.memory_space<vmem>>, vector<1x8x128xf32>
    %1 = vector.shape_cast %0 : vector<1x8x128xf32> to vector<1x1x8x128xf32>
    %cst = arith.constant dense<0.000000e+00> : vector<1xf32>
    %2 = vector.multi_reduction <add>, %1, %cst [1, 2, 3] : vector<1x1x8x128xf32> to vector<1xf32>
    %3 = vector.shape_cast %2 : vector<1xf32> to vector<1x1x1x1xf32>
    %4 = vector.extract %3[0, 0, 0, 0] : f32 from vector<1x1x1x1xf32>
    %5 = vector.broadcast %4 : f32 to vector<1x1x1xf32>
    %cst_2 = arith.constant 9.765625E-4 : f32
    %6 = vector.broadcast %cst_2 : f32 to vector<1x1x1xf32>
    %7 = arith.mulf %5, %6 : vector<1x1x1xf32>
    %8 = vector.broadcast %7 : vector<1x1x1xf32> to vector<1x8x128xf32>
    %9 = arith.subf %0, %8 : vector<1x8x128xf32>
    %10 = arith.mulf %9, %9 : vector<1x8x128xf32>
    %11 = vector.shape_cast %10 : vector<1x8x128xf32> to vector<1x1x8x128xf32>
    %cst_3 = arith.constant dense<0.000000e+00> : vector<1xf32>
    %12 = vector.multi_reduction <add>, %11, %cst_3 [1, 2, 3] : vector<1x1x8x128xf32> to vector<1xf32>
    %13 = vector.shape_cast %12 : vector<1xf32> to vector<1x1x1x1xf32>
    %14 = vector.extract %13[0, 0, 0, 0] : f32 from vector<1x1x1x1xf32>
    %15 = vector.broadcast %14 : f32 to vector<1x1x1xf32>
    %cst_4 = arith.constant 9.77517105E-4 : f32
    %16 = vector.broadcast %cst_4 : f32 to vector<1x1x1xf32>
    %17 = arith.mulf %15, %16 : vector<1x1x1xf32>
    %18 = math.sqrt %17 : vector<1x1x1xf32>
    %cst_5 = arith.constant 9.99999996E-13 : f32
    %19 = vector.broadcast %cst_5 : f32 to vector<1x1x1xf32>
    %20 = arith.addf %18, %19 : vector<1x1x1xf32>
    %cst_6 = arith.constant 1.000000e+00 : f32
    %21 = vector.broadcast %cst_6 : f32 to vector<1x1x1xf32>
    %22 = arith.divf %21, %20 : vector<1x1x1xf32>
    %c0_7 = arith.constant 0 : index
    %c0_8 = arith.constant 0 : index
    %c0_9 = arith.constant 0 : index
    %23 = vector.load %arg2[%c0_7, %c0_8, %c0_9] : memref<1x8x1xf32, #tpu.memory_space<vmem>>, vector<1x8x1xf32>
    %24 = vector.broadcast %22 : vector<1x1x1xf32> to vector<1x8x1xf32>
    %25 = arith.mulf %23, %24 : vector<1x8x1xf32>
    %26 = vector.broadcast %25 : vector<1x8x1xf32> to vector<1x8x128xf32>
    %27 = arith.mulf %9, %26 : vector<1x8x128xf32>
    %c0_10 = arith.constant 0 : index
    %c0_11 = arith.constant 0 : index
    %c0_12 = arith.constant 0 : index
    %28 = vector.load %arg3[%c0_10, %c0_11, %c0_12] : memref<1x8x1xf32, #tpu.memory_space<vmem>>, vector<1x8x1xf32>
    %29 = vector.broadcast %28 : vector<1x8x1xf32> to vector<1x8x128xf32>
    %30 = arith.addf %27, %29 : vector<1x8x128xf32>
    %c0_13 = arith.constant 0 : index
    %c0_14 = arith.constant 0 : index
    %c0_15 = arith.constant 0 : index
    %31 = vector.load %arg4[%c0_13, %c0_14, %c0_15] : memref<1x8x128xf32, #tpu.memory_space<vmem>>, vector<1x8x128xf32>
    tpu.vector_store %arg4[%c0_13, %c0_14, %c0_15], %30 {strides = array<i32>} : memref<1x8x128xf32, #tpu.memory_space<vmem>>, vector<1x8x128xf32>,
    return
  }
  func.func @transform_0(%arg0: i32) -> (i32, i32, i32) {
    %c0_i32 = arith.constant 0 : i32
    %c0_i32_0 = arith.constant 0 : i32
    %c0_i32_1 = arith.constant 0 : i32
    return %arg0, %c0_i32, %c0_i32_0 : i32, i32, i32
  }
  func.func @transform_1(%arg0: i32) -> (i32, i32, i32) {
    %c0_i32 = arith.constant 0 : i32
    %c0_i32_0 = arith.constant 0 : i32
    %c0_i32_1 = arith.constant 0 : i32
    %c0_i32_2 = arith.constant 0 : i32
    return %c0_i32, %c0_i32_0, %c0_i32_1 : i32, i32, i32
  }
  func.func @transform_2(%arg0: i32) -> (i32, i32, i32) {
    %c0_i32 = arith.constant 0 : i32
    %c0_i32_0 = arith.constant 0 : i32
    %c0_i32_1 = arith.constant 0 : i32
    %c0_i32_2 = arith.constant 0 : i32
    return %c0_i32, %c0_i32_0, %c0_i32_1 : i32, i32, i32
  }
  func.func @transform_3(%arg0: i32) -> (i32, i32, i32) {
    %c0_i32 = arith.constant 0 : i32
    %c0_i32_0 = arith.constant 0 : i32
    %c0_i32_1 = arith.constant 0 : i32
    return %arg0, %c0_i32, %c0_i32_0 : i32, i32, i32
  }
}

</mosaic_0001>

<bundles_post_ra>
// kernel: tpu_custom_call.1
= control target key start
LH: loop header
LB: loop body
LE: loop exit
PB: predicated region body
PF: predicated region fallthrough
CT: control target
= control target key end

     0   :  { %8 = vsyncpa [#allocation3], 0  ;;  %s542_s0 = inlined_call_operand.vmem [shape: f32[2,8,128], index: 0, kind: input, shape index: {}]   ;;  %s543_s1 = inlined_call_operand.vmem [shape: f32[1,8,1], index: 1, kind: input, shape index: {}]   ;;  %s544_s2 = inlined_call_operand.vmem [shape: f32[1,8,1], index: 2, kind: input, shape index: {}]   ;;  %s545_s3 = inlined_call_operand.hbm [shape: f32[2,8,128], index: 3, kind: output, shape index: {}]  }
   0x1   :  { %10 = vsyncpa [#allocation3 + $0x1], 0  ;;  %s436_s12 = smov 0   ;;  %s438_s13 = smov 0  }
   0x2   :  { %s440_s14 = smov 0   ;;  %s442_s15 = smov 0  }
   0x3 LB: > { %s457_s16 = sadd.s32 4294967295, %s412_s15   ;;  %s290_s17 = sadd.s32 4294967294, %s412_s15   ;;  %s412_s15 = sphi %s442_s15, %s551_s15   ;;  %s408_s14 = sphi %s440_s14, %s550_s14   ;;  %s404_s13 = sphi %s438_s13, %s549_s13   ;;  %s400_s12 = sphi %s436_s12, %s548_s12  }
   0x4   : > { %s461_s18 = sadd.s32 1, %s412_s15   ;;  %s91_s19 = sadd.s32 1, %s408_s14 }
   0x5   : > { %s88_s20 = ssub.s32 %s412_s15, %s461_s18  ;;  %p101_p0 = scmp.ne.s32.totalorder %s408_s14, %s404_s13 }
   0x6   : > { %p89_p1 = scmp.eq.s32.totalorder %s88_s20, 0  ;;  %p102_p2 = scmp.eq.s32.totalorder %s457_s16, 1 }
   0x7   : > { %p107_p3 = scmp.ne.s32.totalorder %s404_s13, %s400_s12  ;;  %p108_p4 = scmp.eq.s32.totalorder %s290_s17, 1 }
   0x8   : > { %s472_s21 = scalar_select %p89_p1, %s408_s14, %s91_s19  }
   0x9   : > { %p474_p5 = por %p102_p2, %p101_p0  ;;  %p478_p6 = por %p108_p4, %p107_p3 }
   0xa   : > { %p293_p7 = scmp.ge.s32.totalorder %s412_s15, 1  ;;  %p139_p8 = scmp.lt.s32.totalorder %s412_s15, 3 }
   0xc   : > { %p140_p9 = pnand %p293_p7, %p139_p8 }
   0xd   : > { %p162_p10 = scmp.lt.s32.totalorder (!%p140_p9), %s457_s16, 1  ;;  %v414_v12 = vmov (!%p140_p9), 0   ;;  %v201_v28 = vld [vmem:[%s543_s1] sm:$0xff] (!%p140_p9)  ;;  %s159_s8 = sand.u32 (!%p140_p9), 1, %s404_s13  }
   0xe   : > { %143 = sbr.rel (%p140_p9) target bundleno = 622 (0x26e), region = 32  ;;  %344 = vset.pattern.permute.xlu1 (!%p140_p9), %v414_v12  ;;  %345 = vset.pattern.permute.xlu0 (!%p140_p9), %v414_v12  ;;  %v209_v31 = vld [vmem:[%s544_s2] sm:$0xff] (!%p140_p9)  ;;  %s294_s9 = sshll.u32 (!%p140_p9), %s159_s8, 3 }
   0xf   : > { %s297_s10 = sshll.u32 (!%p140_p9), %s457_s16, 7  ;;  %s161_s11 = scalar_lea.vmem (!%p140_p9), [#allocation2], %s294_s9 }
  0x10   : > { %s231_s17 = sshll.u32 (!%p140_p9), %s161_s11, 4  ;;  %s502_s17 = int_to_ptr.vmem [resolvable:$true] %s231_s17 }
  0x11   : > { %s350_s26 = scalar_lea.vmem (!%p140_p9), %s502_s17, 128 }
  0x12   : > { %p351_p11 = scmp.ne.s32.totalorder (!%p140_p9), %s502_s17, %s350_s26 }
  0x14   : > { %p352_p12 = pnand (!%p140_p9), %p351_p11, %p474_p5 }
  0x15   : > { %s163_s24 = scalar_select %p162_p10, %s457_s16, 1 }
  0x16   : > { %p353_p13 = pneg %p352_p12  ;;  %s415_s16 = smov [#allocation2]  }
  0x17   : > { %s295_s25 = sshll.u32 %s163_s24, 3  ;;  %s500_s24 = scalar_lea.hbm %s545_s3, %s297_s10 }
  0x18   : > { %s165_s28 = scalar_lea.vmem %s542_s0, %s295_s25  ;;  %s218_s25 = scalar_lea.sflag [#allocation3], %s159_s8 }
  0x19   : > { %v166_v0 = vld [vmem:[%s165_s28] sm:$0xff]  ;;  %s354_s27 = sshll.u32 %s415_s16, 4  ;;  %s355_s27 = int_to_ptr.vmem [resolvable:$false] %s354_s27 }
  0x1a   : > { %167 = vadd.xlane.f32.xlu0 %v166_v0  ;;  %s356_s28 = scalar_lea.vmem %s355_s27, 256  ;;  %p357_p0 = scmp.lt.s32.totalorder %s502_s17, %s355_s27 }
  0x1b   : > { %p358_p1 = scmp.lt.s32.totalorder %s356_s28, %s350_s26 }
  0x1d   : > { %p359_p2 = por %p358_p1, %p357_p0 }
  0x1f   : > { %p360_p3 = pnand %p359_p2, %p353_p13 }
  0xa7   : > { %v168_v1 = vpop.xlane.xlu0 %167 }
  0xa8   : > { %v169_v2 = vrot.slane %v168_v1, 4 }
  0xaa   : > { %v170_v3 = vadd.f32 %v169_v2, %v168_v1 }
  0xac   : > { %v171_v4 = vrot.slane %v170_v3, 2 }
  0xae   : > { %v172_v5 = vadd.f32 %v171_v4, %v170_v3 }
  0xb0   : > { %v173_v6 = vrot.slane %v172_v5, 1 }
  0xb2   : > { %v174_v7 = vadd.f32 %v173_v6, %v172_v5 }
  0xb4   : > { %300 = vpush %v174_v7 }
  0xe5   : > { %s301_s29 = spop %300 }
  0xe6   : > { %v176_v8 = vstv %s301_s29 }
  0xe7   : > { %v177_v9 = vmul.f32 0.0009765625, %v176_v8 }
  0xe9   : > { %v178_v10 = vsub.f32 %v166_v0, %v177_v9 }
  0xeb   : > { %v179_v11 = vmul.f32 %v178_v10, %v178_v10 }
  0xed   : > { %180 = vadd.xlane.f32.xlu0 %v179_v11 }
 0x17a   : > { %v181_v13 = vpop.xlane.xlu0 %180 }
 0x17b   : > { %v182_v14 = vrot.slane %v181_v13, 4 }
 0x17d   : > { %v183_v15 = vadd.f32 %v182_v14, %v181_v13 }
 0x17f   : > { %v184_v16 = vrot.slane %v183_v15, 2 }
 0x181   : > { %v185_v17 = vadd.f32 %v184_v16, %v183_v15 }
 0x183   : > { %v186_v18 = vrot.slane %v185_v17, 1 }
 0x185   : > { %v187_v19 = vadd.f32 %v186_v18, %v185_v17 }
 0x187   : > { %302 = vpush %v187_v19 }
 0x1b8   : > { %s303_s30 = spop %302 }
 0x1b9   : > { %v189_v20 = vstv %s303_s30 }
 0x1ba   : > { %v190_v21 = vmul.f32 0.0009775171, %v189_v20 }
 0x1bc   : > { %346 = vrsqrt.f32 %v190_v21  ;;  %vm193_vm0 = vcmp.eq.f32.partialorder %v190_v21, inf  ;;  %v196_v24 = vand.u32 2147483648, %v190_v21  ;;  %vm195_vm1 = vcmp.eq.f32.partialorder %v190_v21, 0.0 }
 0x1c6   : > { %v347_v22 = vpop.eup %346 }
 0x1c7   : > { %v192_v23 = vmul.f32 %v347_v22, %v190_v21 }
 0x1c9   : > { %v194_v25 = vsel %vm193_vm0, %v190_v21, %v192_v23 }
 0x1ca   : > { %v197_v26 = vsel %vm195_vm1, %v196_v24, %v194_v25 }
 0x1cb   : > { %v198_v27 = vadd.f32 1e-12, %v197_v26 }
 0x1cd   : > { %348 = vrcp.f32 %v198_v27 }
 0x1d7   : > { %v349_v29 = vpop.eup %348 }
 0x1d8   : > { %v202_v30 = vmul.f32 %v349_v29, %v201_v28 }
 0x1da   : > { %205 = vperm.xlu1 %344, %v202_v30  }
 0x1de   : > { %212 = vperm.xlu1 %344, %v209_v31  }
 0x259   : > { %v206_v32 = vpop.permute.xlu1 %205 }
 0x25a   : > { %v208_v33 = vmul.f32 %v206_v32, %v178_v10 }
 0x25d   : > { %v213_v34 = vpop.permute.xlu1 %212 }
 0x25e   : > { %v215_v35 = vadd.f32 %v213_v34, %v208_v33 }
 0x260   : > { %216 = vst [vmem:[%s161_s11] sm:$0xff] %v215_v35 }
 0x261   : > { %363 = shalt.err (!%p360_p3)
}
 0x262   : > { %s364_s29 = scalar_lea.hbm %s500_s24, 128  ;;  %s368_s5 = scalar_lea.hbm %s545_s3, 256 }
 0x263   : > { %p365_p4 = scmp.ne.s32.totalorder %s500_s24, %s364_s29  ;;  %p369_p9 = scmp.lt.u32.totalorder %s500_s24, %s545_s3 }
 0x264   : > { %p370_p10 = scmp.lt.u32.totalorder %s368_s5, %s364_s29  ;;  %p372_p12 = scmp.lt.u32.totalorder %s364_s29, %s500_s24 }
 0x265   : > { %p366_p7 = pnand %p365_p4, %p474_p5 }
 0x266   : > { %p371_p11 = por %p370_p10, %p369_p9 }
 0x267   : > { %p367_p8 = pneg %p366_p7 }
 0x268   : > { %p373_p13 = por %p372_p12, %p371_p11 }
 0x26a   : > { %p374_p0 = pnand %p373_p13, %p367_p8 }
 0x26c   : > { %377 = shalt.err (!%p374_p0)
}
 0x26d   : > { %304 = dma.vmem_to_hbm [thread:$0]  (%p474_p5), %s502_s17, 128, %s500_s24, %s218_s25  }
 0x26e PF: > { %p310_p1 = scmp.ge.s32.totalorder %s412_s15, 2  ;;  %s243_s8 = sand.u32 1, %s400_s12  }
 0x26f   : > { %s244_s9 = scalar_lea.sflag [#allocation3], %s243_s8 }
 0x270   : > { %p307_p2 = pnand %p310_p1, %p478_p6 }
 0x272   : > { %395 = dma.done.wait (!%p307_p2), %s244_s9, 128  }
 0x273   : > { %397 = vsyncadd (!%p307_p2), %s244_s9, 4294967168  ;;  %p13_p3 = scmp.ge.s32.totalorder %s461_s18, 4   ;;  %s548_s12 = smov %s404_s13 }
 0x274   : > { %s549_s13 = smov %s408_s14  ;;  %s550_s14 = smov %s472_s21 }
 0x275   : > { %s551_s15 = smov %s461_s18  ;;  %15 = sbr.rel (!%p13_p3) target bundleno = 3 (0x3), region = 67 }
 0x27c   :  { %249 = vsyncpa [#allocation3], 1 }
 0x27d   :  { %251 = vsyncpa [#allocation3 + $0x1], 1 }

</bundles_post_ra>
